<compile_context>
chip_gen: v7x
topology: tpu7x:2x2x1
jax: 0.10.0
libtpu: 0.0.40
codegen_flags: <defaults>
</compile_context>

<pallas_src>
import functools

import jax
import jax.numpy as jnp
from jax.experimental import pallas as pl
from jax.experimental.pallas import tpu as pltpu

# Logical sizes of the PyTorch module.
F_IN = 5      # fc1 in_features
F_HID = 50    # fc1 out_features == fc2 in_features
F_OUT = 3     # fc2 out_features

# Padded sizes used only inside VMEM.
HID_PAD = 128                  # lane-padded hidden width
K2_PAD = 128                   # padded fc2 contraction dim
W2_ROW0 = 8                    # w2 starts on a sublane-aligned slab row
SLAB_ROWS = W2_ROW0 + K2_PAD   # 136 (multiple of 8)


def _mlp_kernel(x_ref, p_ref, out_ref):
    x = x_ref[...]                                   # (TB, 5) f32
    b1 = p_ref[F_IN:F_IN + 1, :]                     # (1, 128)
    b2 = p_ref[F_IN + 1:F_IN + 2, :]                 # (1, 128)

    # fc1 (K=5) on the VPU: 5 broadcast multiply-adds, exact f32.  Keeps the
    # tiny contraction off the MXU so fc2 is the only MXU consumer.
    h = x[:, 0:1] * p_ref[0:1, :] + b1               # (TB, 128)
    for k in range(1, F_IN):
        h = h + x[:, k:k + 1] * p_ref[k:k + 1, :]
    h = jnp.maximum(h, 0.0)                          # ReLU

    # fc2 on the MXU: bf16 inputs (single-pass lowering), f32 accumulation.
    w2 = p_ref[W2_ROW0:W2_ROW0 + K2_PAD, :].astype(jnp.bfloat16)   # (128, 128)
    y = jnp.dot(h.astype(jnp.bfloat16), w2,
                preferred_element_type=jnp.float32) + b2            # (TB, 128)

    out_ref[...] = y[:, :F_OUT].astype(out_ref.dtype)               # (TB, 3)


def pack_params(w1, b1, w2, b2):
    """Pack fc1/fc2 params into one padded VMEM slab.

    Inputs are in x @ W orientation: w1 (5, 50), b1 (50,), w2 (50, 3), b2 (3,)
    i.e. the TRANSPOSE of torch's (out, in) weight storage.  Padded regions are
    zero so padded hidden/output columns contribute exactly 0.
    """
    slab = jnp.zeros((SLAB_ROWS, HID_PAD), jnp.float32)
    slab = slab.at[0:F_IN, 0:F_HID].set(w1.astype(jnp.float32))
    slab = slab.at[F_IN, 0:F_HID].set(b1.astype(jnp.float32))
    slab = slab.at[F_IN + 1, 0:F_OUT].set(b2.astype(jnp.float32))
    slab = slab.at[W2_ROW0:W2_ROW0 + F_HID, 0:F_OUT].set(w2.astype(jnp.float32))
    return slab


def _round_up(n, m):
    return -(-n // m) * m


@functools.partial(jax.jit, static_argnames=("max_tb",))
def network_traffic_model(x, params, *, max_tb=4096):
    """x: (B, 5) f32; params: (136, 128) slab from pack_params(). Returns (B, 3)."""
    B = x.shape[0]
    max_tb = max(8, _round_up(max_tb, 8))

    if B >= 8:
        # >=2 grid steps whenever possible so v7x's two TensorCores both get
        # work; tile rows stay a multiple of 8 (f32 sublanes).
        TB = min(max_tb, _round_up(-(-B // 2), 8))
    else:
        TB = B  # block == full array dim -> legal BlockSpec, single step
    grid = (pl.cdiv(B, TB),)

    return pl.pallas_call(
        _mlp_kernel,
        out_shape=jax.ShapeDtypeStruct((B, F_OUT), jnp.float32),
        grid=grid,
        in_specs=[
            pl.BlockSpec((TB, F_IN), lambda i: (i, 0)),            # streamed x
            pl.BlockSpec((SLAB_ROWS, HID_PAD), lambda i: (0, 0)),  # resident params
        ],
        out_specs=pl.BlockSpec((TB, F_OUT), lambda i: (i, 0)),
        compiler_params=pltpu.CompilerParams(
            dimension_semantics=("parallel",),
            vmem_limit_bytes=48 * 1024 * 1024),
    )(x, params)


if __name__ == "__main__":
    key = jax.random.PRNGKey(0)
    k_x, k_p, k_x2 = jax.random.split(key, 3)

    # torch.nn.Linear-style uniform init (stored pre-transposed as (in, out)).
    k1, k2, k3, k4 = jax.random.split(k_p, 4)
    bound1 = 1.0 / jnp.sqrt(float(F_IN))
    bound2 = 1.0 / jnp.sqrt(float(F_HID))
    w1 = jax.random.uniform(k1, (F_IN, F_HID), jnp.float32, -bound1, bound1)
    b1 = jax.random.uniform(k2, (F_HID,), jnp.float32, -bound1, bound1)
    w2 = jax.random.uniform(k3, (F_HID, F_OUT), jnp.float32, -bound2, bound2)
    b2 = jax.random.uniform(k4, (F_OUT,), jnp.float32, -bound2, bound2)
    params = pack_params(w1, b1, w2, b2)

    hi = jax.lax.Precision.HIGHEST

    def ref_f32(xx):
        # True fp32 reference (PyTorch semantics).
        h = jnp.maximum(jnp.dot(xx, w1, precision=hi) + b1[None, :], 0.0)
        return jnp.dot(h, w2, precision=hi) + b2[None, :]

    def ref_mxu(xx):
        # Precision-matched reference: exact-f32 fc1, bf16-input/f32-acc fc2,
        # mirroring the kernel's MXU path (structural correctness check).
        h = jnp.maximum(jnp.dot(xx, w1, precision=hi) + b1[None, :], 0.0)
        hq = h.astype(jnp.bfloat16).astype(jnp.float32)
        w2q = w2.astype(jnp.bfloat16).astype(jnp.float32)
        return jnp.dot(hq, w2q, precision=hi) + b2[None, :]

    # Small batch: 16 rows -> tile 8 -> 2 grid steps (exercises the megacore
    # split and the resident-params path).
    x = jax.random.normal(k_x, (16, F_IN), jnp.float32)
    out = jax.block_until_ready(network_traffic_model(x, params))
    assert out.shape == (16, F_OUT)
    assert jnp.allclose(out, ref_mxu(x), atol=3e-3, rtol=1e-3)
    # bf16 MXU inputs => ~1e-3 typical deviation vs true fp32 (documented).
    assert jnp.allclose(out, ref_f32(x), atol=2e-2, rtol=2e-2)

    # Odd batch: multi-step grid with a partial final tile, no host-side
    # pad/slice copies.
    x2 = jax.random.normal(k_x2, (3001, F_IN), jnp.float32)
    out2 = jax.block_until_ready(network_traffic_model(x2, params, max_tb=1024))
    assert out2.shape == (3001, F_OUT)
    assert jnp.allclose(out2, ref_mxu(x2), atol=3e-3, rtol=1e-3)
    assert jnp.allclose(out2, ref_f32(x2), atol=2e-2, rtol=2e-2)

    print("KERNEL_OK")
</pallas_src>

<mosaic_0001>
module attributes {stable_mosaic.version = 11 : i64} {
  func.func @_mlp_kernel(%arg0: i32, %arg1: memref<8x5xf32, #tpu.memory_space<vmem>>, %arg2: memref<136x128xf32, #tpu.memory_space<vmem>>, %arg3: memref<8x3xf32, #tpu.memory_space<vmem>>) attributes {dimension_semantics = [#tpu.dimension_semantics<parallel>], iteration_bounds = array<i64: 2>, scalar_prefetch = 0 : i64, scratch_operands = 0 : i64, tpu.core_type = #tpu.core_type<tc>, window_params = [{transform_indices = @transform_0, window_bounds = array<i64: 8, 5>}, {pipeline_mode = #tpu.pipeline_mode<synchronous>, transform_indices = @transform_1, window_bounds = array<i64: 136, 128>}, {transform_indices = @transform_2, window_bounds = array<i64: 8, 3>}]} {
    %c0 = arith.constant 0 : index
    %c0_0 = arith.constant 0 : index
    %0 = vector.load %arg1[%c0, %c0_0] : memref<8x5xf32, #tpu.memory_space<vmem>>, vector<8x5xf32>
    %c5 = arith.constant 5 : index
    %c0_1 = arith.constant 0 : index
    %1 = vector.load %arg2[%c5, %c0_1] : memref<136x128xf32, #tpu.memory_space<vmem>>, vector<1x128xf32>
    %c6 = arith.constant 6 : index
    %c0_2 = arith.constant 0 : index
    %2 = vector.load %arg2[%c6, %c0_2] : memref<136x128xf32, #tpu.memory_space<vmem>>, vector<1x128xf32>
    %3 = vector.extract_strided_slice %0 {offsets = [0, 0], sizes = [8, 1], strides = [1, 1]} : vector<8x5xf32> to vector<8x1xf32>
    %c0_3 = arith.constant 0 : index
    %c0_4 = arith.constant 0 : index
    %4 = vector.load %arg2[%c0_3, %c0_4] : memref<136x128xf32, #tpu.memory_space<vmem>>, vector<1x128xf32>
    %5 = vector.broadcast %3 : vector<8x1xf32> to vector<8x128xf32>
    %6 = vector.broadcast %4 : vector<1x128xf32> to vector<8x128xf32>
    %7 = arith.mulf %5, %6 : vector<8x128xf32>
    %8 = vector.broadcast %1 : vector<1x128xf32> to vector<8x128xf32>
    %9 = arith.addf %7, %8 : vector<8x128xf32>
    %10 = vector.extract_strided_slice %0 {offsets = [0, 1], sizes = [8, 1], strides = [1, 1]} : vector<8x5xf32> to vector<8x1xf32>
    %c1 = arith.constant 1 : index
    %c0_5 = arith.constant 0 : index
    %11 = vector.load %arg2[%c1, %c0_5] : memref<136x128xf32, #tpu.memory_space<vmem>>, vector<1x128xf32>
    %12 = vector.broadcast %10 : vector<8x1xf32> to vector<8x128xf32>
    %13 = vector.broadcast %11 : vector<1x128xf32> to vector<8x128xf32>
    %14 = arith.mulf %12, %13 : vector<8x128xf32>
    %15 = arith.addf %9, %14 : vector<8x128xf32>
    %16 = vector.extract_strided_slice %0 {offsets = [0, 2], sizes = [8, 1], strides = [1, 1]} : vector<8x5xf32> to vector<8x1xf32>
    %c2 = arith.constant 2 : index
    %c0_6 = arith.constant 0 : index
    %17 = vector.load %arg2[%c2, %c0_6] : memref<136x128xf32, #tpu.memory_space<vmem>>, vector<1x128xf32>
    %18 = vector.broadcast %16 : vector<8x1xf32> to vector<8x128xf32>
    %19 = vector.broadcast %17 : vector<1x128xf32> to vector<8x128xf32>
    %20 = arith.mulf %18, %19 : vector<8x128xf32>
    %21 = arith.addf %15, %20 : vector<8x128xf32>
    %22 = vector.extract_strided_slice %0 {offsets = [0, 3], sizes = [8, 1], strides = [1, 1]} : vector<8x5xf32> to vector<8x1xf32>
    %c3 = arith.constant 3 : index
    %c0_7 = arith.constant 0 : index
    %23 = vector.load %arg2[%c3, %c0_7] : memref<136x128xf32, #tpu.memory_space<vmem>>, vector<1x128xf32>
    %24 = vector.broadcast %22 : vector<8x1xf32> to vector<8x128xf32>
    %25 = vector.broadcast %23 : vector<1x128xf32> to vector<8x128xf32>
    %26 = arith.mulf %24, %25 : vector<8x128xf32>
    %27 = arith.addf %21, %26 : vector<8x128xf32>
    %28 = vector.extract_strided_slice %0 {offsets = [0, 4], sizes = [8, 1], strides = [1, 1]} : vector<8x5xf32> to vector<8x1xf32>
    %c4 = arith.constant 4 : index
    %c0_8 = arith.constant 0 : index
    %29 = vector.load %arg2[%c4, %c0_8] : memref<136x128xf32, #tpu.memory_space<vmem>>, vector<1x128xf32>
    %30 = vector.broadcast %28 : vector<8x1xf32> to vector<8x128xf32>
    %31 = vector.broadcast %29 : vector<1x128xf32> to vector<8x128xf32>
    %32 = arith.mulf %30, %31 : vector<8x128xf32>
    %33 = arith.addf %27, %32 : vector<8x128xf32>
    %cst = arith.constant 0.000000e+00 : f32
    %34 = vector.broadcast %cst : f32 to vector<8x128xf32>
    %35 = arith.maximumf %33, %34 : vector<8x128xf32>
    %c8 = arith.constant 8 : index
    %c0_9 = arith.constant 0 : index
    %36 = vector.load %arg2[%c8, %c0_9] : memref<136x128xf32, #tpu.memory_space<vmem>>, vector<128x128xf32>
    %37 = arith.truncf %36 : vector<128x128xf32> to vector<128x128xbf16>
    %38 = arith.truncf %35 : vector<8x128xf32> to vector<8x128xbf16>
    %cst_10 = arith.constant dense<0.000000e+00> : vector<8x128xf32>
    %39 = tpu.matmul %38, %37, %cst_10 {dimension_numbers = #tpu.dot_dimension_numbers<[1], [0], [0], [1], [0, 0, 1, 1], [], []>} : vector<8x128xbf16>, vector<128x128xbf16>, vector<8x128xf32> -> vector<8x128xf32>
    %40 = vector.broadcast %2 : vector<1x128xf32> to vector<8x128xf32>
    %41 = arith.addf %39, %40 : vector<8x128xf32>
    %42 = vector.extract_strided_slice %41 {offsets = [0, 0], sizes = [8, 3], strides = [1, 1]} : vector<8x128xf32> to vector<8x3xf32>
    %c0_11 = arith.constant 0 : index
    %c0_12 = arith.constant 0 : index
    %43 = vector.load %arg3[%c0_11, %c0_12] : memref<8x3xf32, #tpu.memory_space<vmem>>, vector<8x3xf32>
    tpu.vector_store %arg3[%c0_11, %c0_12], %42 {strides = array<i32>} : memref<8x3xf32, #tpu.memory_space<vmem>>, vector<8x3xf32>,
    return
  }
  func.func @transform_0(%arg0: i32) -> (i32, i32) {
    %c0_i32 = arith.constant 0 : i32
    %c0_i32_0 = arith.constant 0 : i32
    return %arg0, %c0_i32 : i32, i32
  }
  func.func @transform_1(%arg0: i32) -> (i32, i32) {
    %c0_i32 = arith.constant 0 : i32
    %c0_i32_0 = arith.constant 0 : i32
    %c0_i32_1 = arith.constant 0 : i32
    return %c0_i32, %c0_i32_0 : i32, i32
  }
  func.func @transform_2(%arg0: i32) -> (i32, i32) {
    %c0_i32 = arith.constant 0 : i32
    %c0_i32_0 = arith.constant 0 : i32
    return %arg0, %c0_i32 : i32, i32
  }
}

</mosaic_0001>

<bundles_post_ra>
// kernel: network_traffic_model.1
= control target key start
LH: loop header
LB: loop body
LE: loop exit
PB: predicated region body
PF: predicated region fallthrough
CT: control target
= control target key end

     0   :  { %7 = vsyncpa [#allocation3], 0  ;;  %s501_s9 = smov 0   ;;  %s564_s0 = inlined_call_operand.vmem [shape: f32[16,5], index: 0, kind: input, shape index: {}]   ;;  %s565_s1 = inlined_call_operand.hbm [shape: f32[136,128], index: 1, kind: input, shape index: {}]   ;;  %s566_s2 = inlined_call_operand.vmem [shape: f32[16,3], index: 2, kind: output, shape index: {}]  }
   0x1 LB: > { %s507_s10 = sadd.s32 4294967295, %s474_s9   ;;  %p357_p0 = scmp.ge.s32.totalorder %s474_s9, 1  ;;  %s474_s9 = sphi %s501_s9, %s13_s9  }
   0x2   : > { %p91_p1 = scmp.lt.s32.totalorder %s474_s9, 3  ;;  %s476_s11 = smov [#allocation2]  }
   0x3   : > { %s103_s12 = sshll.u32 %s476_s11, 4  ;;  %p567_p3 = scmp.eq.s32.totalorder %s507_s10, 0  ;;  %s104_s12 = int_to_ptr.vmem [resolvable:$true] %s103_s12 }
   0x4   : > { %p511_p2 = pnand %p357_p0, %p91_p1  ;;  %s436_s17 = scalar_lea.hbm %s565_s1, 2176 }
   0x5   : > { %p437_p6 = scmp.ne.s32.totalorder %s565_s1, %s436_s17  ;;  %p443_p10 = scmp.lt.u32.totalorder %s436_s17, %s565_s1 }
   0x6   : > { %s569_s13 = scalar_select %p511_p2, 1, 0 }
   0x7   : > { %p406_p4 = pneg %p511_p2 }
   0x9   : > { %p520_p5 = pnand %p567_p3, %p406_p4 }
   0xb   : > { %p438_p7 = pneg %p520_p5 }
   0xd   : > { %p439_p8 = pnand %p438_p7, %p437_p6 }
   0xf   : > { %p440_p9 = pneg %p439_p8 }
  0x11   : > { %p445_p11 = pnand %p443_p10, %p440_p9 }
  0x13   : > { %448 = shalt.err (!%p445_p11)
}
  0x14   : > { %s449_s22 = scalar_lea.vmem %s104_s12, 2176  ;;  %p457_p1 = scmp.lt.s32.totalorder %s104_s12, %s104_s12 }
  0x15   : > { %p450_p12 = scmp.ne.s32.totalorder %s104_s12, %s449_s22  ;;  %p458_p4 = scmp.lt.s32.totalorder %s449_s22, %s449_s22 }
  0x17   : > { %p452_p13 = pnand %p450_p12, %p438_p7  ;;  %p459_p3 = por %p458_p4, %p457_p1 }
  0x19   : > { %p453_p0 = pneg %p452_p13 }
  0x1b   : > { %p460_p2 = pnand %p459_p3, %p453_p0 }
  0x1d   : > { %463 = shalt.err (!%p460_p2)
}
  0x1e   : > { %s477_s23 = smov 128   ;;  %s478_s24 = smov 8  }
  0x1f   : > { %409 = dma.hbm_to_vmem [thread:$0]  (!%p520_p5), %s565_s1, 2176, %s104_s12, [#allocation3], %s477_s23, %s477_s23, %s478_s24  }
  0x20   : > { %p571_p6 = scmp.ne.s32.totalorder %s569_s13, 0 }
  0x21   : > { %p572_p8 = scmp.eq.s32.totalorder (!%p571_p6), %s507_s10, 0 }
  0x22   : > { %126 = sbr.rel (%p571_p6) target bundleno = 410 (0x19a), region = 28 }
  0x29   : > { %469 = dma.done.wait (%p572_p8), [#allocation3], 2176   ;;  %p573_p7 = pmov %p572_p8 }
  0x2a   : > { %p146_p2 = scmp.lt.s32.totalorder %s507_s10, 1  ;;  %v479_v0 = vmov 0   ;;  %v480_v1 = vmov 2   ;;  %v481_v2 = vmov 0.0   ;;  %v219_v4 = vld [vmem:[#allocation2 + $0x8] sm:$0xff]  ;;  %v220_v5 = vld [vmem:[#allocation2 + $0x10] sm:$0xff] }
  0x2b   : > { %471 = vsyncadd (%p573_p7), [#allocation3], 4294965120  ;;  %430 = vset.pattern.permute.xlu0 %v479_v0  ;;  %432 = vset.pattern.permute.xlu1 %v480_v1  ;;  %v235_v6 = vpack.c.bf16 %v220_v5, %v219_v4  ;;  %v221_v7 = vld [vmem:[#allocation2 + $0x18] sm:$0xff]  ;;  %v222_v8 = vld [vmem:[#allocation2 + $0x20] sm:$0xff]  ;;  %v482_v12 = vmov 1   ;;  %v483_v13 = vmov 3  }
  0x2c   : > { %s575_s10 = smov (!%p146_p2, %s507_s10), 1  ;;  %382 = vmatprep.subr.bf16.mxu0 %v481_v2  ;;  %v236_v9 = vpack.c.bf16 %v222_v8, %v221_v7  ;;  %v223_v10 = vld [vmem:[#allocation2 + $0x28] sm:$0xff]  ;;  %v224_v11 = vld [vmem:[#allocation2 + $0x30] sm:$0xff]  ;;  %v225_v15 = vld [vmem:[#allocation2 + $0x38] sm:$0xff]  ;;  %v484_v17 = vmov 4   ;;  %vm485_vm0 = vmmov 0  }
  0x2d   : > { %s362_s27 = sshll.u32 %s575_s10, 3  ;;  %383 = vmatpush3.bf16.msra.mxu0 %v235_v6  ;;  %v237_v14 = vpack.c.bf16 %v224_v11, %v223_v10  ;;  %v226_v16 = vld [vmem:[#allocation2 + $0x40] sm:$0xff]  ;;  %v227_v19 = vld [vmem:[#allocation2 + $0x48] sm:$0xff]  ;;  %v228_v20 = vld [vmem:[#allocation2 + $0x50] sm:$0xff]  ;;  %398 = vmatprep.mubr.msk.bf16.mxu0 %vm485_vm0, %v481_v2  ;;  %vm288_vm1 = vcmask 23552  }
  0x2e   : > { %s149_s30 = scalar_lea.vmem %s564_s0, %s362_s27  ;;  %384 = vmatprep.subr.bf16.mxu0 %v481_v2  ;;  %v238_v18 = vpack.c.bf16 %v226_v16, %v225_v15  ;;  %v239_v21 = vpack.c.bf16 %v228_v20, %v227_v19  ;;  %v229_v22 = vld [vmem:[#allocation2 + $0x58] sm:$0xff]  ;;  %v230_v23 = vld [vmem:[#allocation2 + $0x60] sm:$0xff]  ;;  %v231_v25 = vld [vmem:[#allocation2 + $0x68] sm:$0xff]  ;;  %s153_s5 = scalar_lea.vmem %s566_s2, %s362_s27 }
  0x2f   : > { %v155_v3 = vld [vmem:[%s149_s30] sm:$0xff]  ;;  %v240_v24 = vpack.c.bf16 %v230_v23, %v229_v22  ;;  %v232_v26 = vld [vmem:[#allocation2 + $0x70] sm:$0xff]  ;;  %v233_v28 = vld [vmem:[#allocation2 + $0x78] sm:$0xff] }
  0x30   : > { %161 = vperm.xlu0 %430, %v155_v3   ;;  %187 = vperm.xlu1 %432, %v155_v3   ;;  %v241_v27 = vpack.c.bf16 %v232_v26, %v231_v25  ;;  %v234_v29 = vld [vmem:[#allocation2 + $0x80] sm:$0xff] }
  0x31   : > { %385 = vmatpush3.bf16.msra.mxu0 %v236_v9  ;;  %v242_v30 = vpack.c.bf16 %v234_v29, %v233_v28  ;;  %v364_v31 = vld [vmem:[#allocation2] ss:$0 sm:$0xff]  ;;  %v365_v35 = vld [vmem:[#allocation2 + $0x5] ss:$0 sm:$0xff]  ;;  %v366_v36 = vld [vmem:[#allocation2 + $0x1] ss:$0 sm:$0xff] }
  0x32   : > { %386 = vmatprep.subr.bf16.mxu0 %v481_v2  ;;  %v367_v37 = vld [vmem:[#allocation2 + $0x2] ss:$0 sm:$0xff]  ;;  %v368_v42 = vld [vmem:[#allocation2 + $0x3] ss:$0 sm:$0xff]  ;;  %v369_v45 = vld [vmem:[#allocation2 + $0x4] ss:$0 sm:$0xff] }
  0x33   : > { %v370_v54 = vld [vmem:[#allocation2 + $0x6] ss:$0 sm:$0xff] }
  0x34   : > { %431 = vset.pattern.permute.xlu0 %v482_v12  ;;  %433 = vset.pattern.permute.xlu1 %v483_v13 }
  0x35   : > { %176 = vperm.xlu0 %431, %v155_v3   ;;  %198 = vperm.xlu1 %433, %v155_v3  }
  0x36   : > { %387 = vmatpush3.bf16.msra.mxu0 %v237_v14 }
  0x37   : > { %388 = vmatprep.subr.bf16.mxu0 %v481_v2 }
  0x39   : > { %434 = vset.pattern.permute.xlu1 %v484_v17  ;;  %435 = vset.pattern.permute.xlu0 %v484_v17 }
  0x3a   : > { %209 = vperm.xlu1 %434, %v155_v3   ;;  %389 = vmatpush3.bf16.msra.mxu0 %v238_v18 }
  0x3b   : > { %390 = vmatprep.subr.bf16.mxu0 %v481_v2 }
  0x3e   : > { %391 = vmatpush3.bf16.msra.mxu0 %v239_v21 }
  0x3f   : > { %392 = vmatprep.subr.bf16.mxu0 %v481_v2 }
  0x42   : > { %393 = vmatpush3.bf16.msra.mxu0 %v240_v24 }
  0x43   : > { %394 = vmatprep.subr.bf16.mxu0 %v481_v2 }
  0x46   : > { %395 = vmatpush3.bf16.msra.mxu0 %v241_v27 }
  0x47   : > { %396 = vmatprep.subr.bf16.mxu0 %v481_v2 }
  0x4a   : > { %397 = vmatpush3.bf16.msra.mxu0 %v242_v30 }
  0xaf   : > { %v162_v32 = vpop.permute.xlu0 %161  ;;  %v188_v33 = vpop.permute.xlu1 %187 }
  0xb0   : > { %v168_v34 = vmul.f32 %v364_v31, %v162_v32  ;;  %v194_v43 = vmul.f32 %v367_v37, %v188_v33 }
  0xb2   : > { %v173_v40 = vadd.f32 %v365_v35, %v168_v34 }
  0xb4   : > { %v177_v38 = vpop.permute.xlu0 %176  ;;  %v199_v39 = vpop.permute.xlu1 %198 }
  0xb5   : > { %v183_v41 = vmul.f32 %v366_v36, %v177_v38  ;;  %v205_v47 = vmul.f32 %v368_v42, %v199_v39 }
  0xb7   : > { %v184_v44 = vadd.f32 %v183_v41, %v173_v40 }
  0xb9   : > { %v195_v46 = vadd.f32 %v194_v43, %v184_v44  ;;  %v210_v48 = vpop.permute.xlu1 %209 }
  0xba   : > { %v216_v49 = vmul.f32 %v369_v45, %v210_v48 }
  0xbb   : > { %v206_v50 = vadd.f32 %v205_v47, %v195_v46 }
  0xbd   : > { %v217_v51 = vadd.f32 %v216_v49, %v206_v50 }
  0xbf   : > { %v218_v52 = vmax.f32 %v217_v51, 0.0 }
  0xc1   : > { %v243_v53 = vpack.c.bf16 %v218_v52, %v218_v52 }
  0xc3   : > { %399 = vmatmul.mubr.bf16.vlgmr.msra.gmra.mrb[0].mxu0 %v243_v53 }
 0x196   : > { %v282_v55 = vpop.f32.mrb[0].mxu0 }
 0x197   : > { %v283_v56 = vadd.f32 %v370_v54, %v282_v55  ;;  %v400_v57 = vpop.f32.mrb[1].mxu0 }
 0x198   : > { %v285_v58 = vpop.f32.mrb[2].mxu0 }
 0x199   : > { %289 = vst.msk [vmem:[%s153_s5] sm:$0xff] %vm288_vm1, %v283_v56  ;;  %v401_v59 = vpop.f32.mrb[3].mxu0 }
 0x19a PF: > { %s13_s9 = sadd.s32 1, %s474_s9  }
 0x19b   : > { %p10_p3 = scmp.ge.s32.totalorder %s13_s9, 4  }
 0x19d   :  { %12 = sbr.rel (!%p10_p3) target bundleno = 1 (0x1), region = 63 }
 0x1a4   :  { %309 = vsyncpa [#allocation3], 1 }
 0x1a5   :  { %311 = vsyncpa [#allocation3 + $0x1], 1 }

</bundles_post_ra>
